<compile_context>
chip_gen: v5e
topology: v5e:2x2
jax: 0.10.0
libtpu: 0.0.40
codegen_flags: <defaults>
</compile_context>

<pallas_src>
import jax
import jax.numpy as jnp
from jax.experimental import pallas as pl
from jax.experimental.pallas import tpu as pltpu

# ---- scaled-down config (analog of hidden_size=1024, seq~510) --------------
NUM_LABELS = 3                      # module default
CLS_OUT    = 6 * NUM_LABELS        # classifier out_features = 18
D_MODEL    = 32                    # analog of hidden_size = 1024
PAD        = (510 - 500) // 2      # = 5, exactly as in the module
BATCH      = 2
SEQ_TOK    = 10                    # tokens after dropping the first one
SEQ_IN     = SEQ_TOK + 1           # raw input length
VOCAB      = 32                    # stand-in embedding table size
OUT_LEN    = SEQ_TOK * 6 - 2 * PAD # = 50, last dim of the module output


def _classifier_kernel(h_ref, w_ref, b_ref, out_ref):
    """Fused stand-in activation + token classifier for the WHOLE batch.

    h_ref   : [B*T, D]     pre-activation hidden states (stand-in encoder)
    w_ref   : [D, 6L]      classifier weight (in_features, out_features)
    b_ref   : [1, 6L]      classifier bias
    out_ref : [B*T, 6L]    per-token classifier logits (natural MXU layout)
    """
    x = h_ref[...]
    x = x * jax.nn.sigmoid(x)            # fused SiLU (EUP + VALU, under MXU work)
    out_ref[...] = (
        jnp.dot(x, w_ref[...], preferred_element_type=jnp.float32) + b_ref[...]
    )


def init_params(key):
    k_emb, k_w, k_b = jax.random.split(key, 3)
    return {
        "emb":   jax.random.normal(k_emb, (VOCAB, D_MODEL), jnp.float32) * 0.02,
        "w_cls": jax.random.normal(k_w, (D_MODEL, CLS_OUT), jnp.float32) * 0.02,
        "b_cls": jax.random.normal(k_b, (CLS_OUT,), jnp.float32) * 0.02,
    }


def nt_token_cls_forward(input_ids, params):
    # wrapper: drop first token
    ids = input_ids[:, 1:]                                   # [B, T]

    # TODO(synk): the injected `model` (NT encoder consuming attention_mask =
    # input_ids > 1 and returning hidden_states[-1]) is a black-box dependency;
    # replaced by a deterministic embedding-lookup stand-in whose SiLU
    # activation is fused into the Pallas kernel below.
    h = jnp.take(params["emb"], ids, axis=0)                 # [B, T, D] (gather in XLA)
    bsz, t, d = h.shape
    h_flat = h.reshape(bsz * t, d)                           # one matmul for the batch

    logits_flat = pl.pallas_call(
        _classifier_kernel,
        out_shape=jax.ShapeDtypeStruct((bsz * t, CLS_OUT), jnp.float32),
        grid_spec=pltpu.PrefetchScalarGridSpec(
            num_scalar_prefetch=0,
            grid=(1,),                                       # grid overhead collapsed
            in_specs=[
                pl.BlockSpec((bsz * t, d), lambda i: (0, 0)),
                pl.BlockSpec((d, CLS_OUT), lambda i: (0, 0)),
                pl.BlockSpec((1, CLS_OUT), lambda i: (0, 0)),
            ],
            out_specs=pl.BlockSpec((bsz * t, CLS_OUT), lambda i: (0, 0)),
        ),
        compiler_params=pltpu.CompilerParams(
            dimension_semantics=("arbitrary",)),
    )(h_flat, params["w_cls"], params["b_cls"].reshape(1, -1))

    # Wrapper-side layout plumbing (zero FLOPs), exactly as the PyTorch forward:
    logits = logits_flat.reshape(bsz, t * 6, NUM_LABELS)     # [B, T*6, L]
    logits = logits[:, PAD:-PAD, :]                          # [B, T*6 - 2*pad, L]
    return jnp.swapaxes(logits, 1, 2)                        # [B, L, T*6 - 2*pad]


def _reference(input_ids, params):
    """Pure-JAX reference mirroring the PyTorch forward exactly."""
    ids = input_ids[:, 1:]
    h = jnp.take(params["emb"], ids, axis=0)
    h = h * jax.nn.sigmoid(h)                                # stand-in encoder body
    logits = jnp.einsum("btd,dc->btc", h, params["w_cls"],
                        precision=jax.lax.Precision.HIGHEST) + params["b_cls"]
    b = logits.shape[0]
    logits = logits.reshape(b, -1, NUM_LABELS)
    logits = logits[:, PAD:-PAD, :]
    return jnp.swapaxes(logits, 1, 2)


if __name__ == "__main__":
    key = jax.random.PRNGKey(0)
    k_params, k_ids = jax.random.split(key)
    params = init_params(k_params)
    input_ids = jax.random.randint(k_ids, (BATCH, SEQ_IN), 0, VOCAB,
                                   dtype=jnp.int32)

    out = jax.block_until_ready(nt_token_cls_forward(input_ids, params))
    ref = _reference(input_ids, params)

    assert out.shape == (BATCH, NUM_LABELS, OUT_LEN), out.shape
    assert jnp.allclose(out, ref, atol=1e-5, rtol=1e-5), "mismatch vs reference"
    print("KERNEL_OK")
</pallas_src>

<mosaic_0001>
module attributes {stable_mosaic.version = 11 : i64} {
  func.func @_classifier_kernel(%arg0: i32, %arg1: memref<20x32xf32, #tpu.memory_space<vmem>>, %arg2: memref<32x18xf32, #tpu.memory_space<vmem>>, %arg3: memref<1x18xf32, #tpu.memory_space<vmem>>, %arg4: memref<20x18xf32, #tpu.memory_space<vmem>>) attributes {dimension_semantics = [#tpu.dimension_semantics<arbitrary>], iteration_bounds = array<i64: 1>, scalar_prefetch = 0 : i64, scratch_operands = 0 : i64, tpu.core_type = #tpu.core_type<tc>, window_params = [{pipeline_mode = #tpu.pipeline_mode<synchronous>, transform_indices = @transform_0, window_bounds = array<i64: 20, 32>}, {pipeline_mode = #tpu.pipeline_mode<synchronous>, transform_indices = @transform_1, window_bounds = array<i64: 32, 18>}, {pipeline_mode = #tpu.pipeline_mode<synchronous>, transform_indices = @transform_2, window_bounds = array<i64: 1, 18>}, {pipeline_mode = #tpu.pipeline_mode<synchronous>, transform_indices = @transform_3, window_bounds = array<i64: 20, 18>}]} {
    %c0 = arith.constant 0 : index
    %c0_0 = arith.constant 0 : index
    %0 = vector.load %arg1[%c0, %c0_0] : memref<20x32xf32, #tpu.memory_space<vmem>>, vector<20x32xf32>
    %1 = arith.negf %0 : vector<20x32xf32>
    %2 = math.exp %1 : vector<20x32xf32>
    %cst = arith.constant 1.000000e+00 : f32
    %3 = vector.broadcast %cst : f32 to vector<20x32xf32>
    %4 = arith.addf %3, %2 : vector<20x32xf32>
    %5 = arith.divf %3, %4 : vector<20x32xf32>
    %6 = arith.mulf %0, %5 : vector<20x32xf32>
    %c0_1 = arith.constant 0 : index
    %c0_2 = arith.constant 0 : index
    %7 = vector.load %arg2[%c0_1, %c0_2] : memref<32x18xf32, #tpu.memory_space<vmem>>, vector<32x18xf32>
    %cst_3 = arith.constant dense<0.000000e+00> : vector<20x18xf32>
    %8 = tpu.matmul %6, %7, %cst_3 {dimension_numbers = #tpu.dot_dimension_numbers<[1], [0], [0], [1], [0, 0, 1, 1], [], []>} : vector<20x32xf32>, vector<32x18xf32>, vector<20x18xf32> -> vector<20x18xf32>
    %c0_4 = arith.constant 0 : index
    %c0_5 = arith.constant 0 : index
    %9 = vector.load %arg3[%c0_4, %c0_5] : memref<1x18xf32, #tpu.memory_space<vmem>>, vector<1x18xf32>
    %10 = vector.broadcast %9 : vector<1x18xf32> to vector<20x18xf32>
    %11 = arith.addf %8, %10 : vector<20x18xf32>
    %c0_6 = arith.constant 0 : index
    %c0_7 = arith.constant 0 : index
    %12 = vector.load %arg4[%c0_6, %c0_7] : memref<20x18xf32, #tpu.memory_space<vmem>>, vector<20x18xf32>
    tpu.vector_store %arg4[%c0_6, %c0_7], %11 {strides = array<i32>} : memref<20x18xf32, #tpu.memory_space<vmem>>, vector<20x18xf32>,
    return
  }
  func.func @transform_0(%arg0: i32) -> (i32, i32) {
    %c0_i32 = arith.constant 0 : i32
    %c0_i32_0 = arith.constant 0 : i32
    %c0_i32_1 = arith.constant 0 : i32
    return %c0_i32, %c0_i32_0 : i32, i32
  }
  func.func @transform_1(%arg0: i32) -> (i32, i32) {
    %c0_i32 = arith.constant 0 : i32
    %c0_i32_0 = arith.constant 0 : i32
    %c0_i32_1 = arith.constant 0 : i32
    return %c0_i32, %c0_i32_0 : i32, i32
  }
  func.func @transform_2(%arg0: i32) -> (i32, i32) {
    %c0_i32 = arith.constant 0 : i32
    %c0_i32_0 = arith.constant 0 : i32
    %c0_i32_1 = arith.constant 0 : i32
    return %c0_i32, %c0_i32_0 : i32, i32
  }
  func.func @transform_3(%arg0: i32) -> (i32, i32) {
    %c0_i32 = arith.constant 0 : i32
    %c0_i32_0 = arith.constant 0 : i32
    %c0_i32_1 = arith.constant 0 : i32
    return %c0_i32, %c0_i32_0 : i32, i32
  }
}

</mosaic_0001>

<bundles_post_ra>
// kernel: tpu_custom_call.1
= control target key start
LH: loop header
LB: loop body
LE: loop exit
PB: predicated region body
PF: predicated region fallthrough
CT: control target
= control target key end

     0   :  { %s269_s0 = inlined_call_operand.vmem [shape: f32[20,32], index: 0, kind: input, shape index: {}]   ;;  %s270_s1 = inlined_call_operand.vmem [shape: f32[32,18], index: 1, kind: input, shape index: {}]   ;;  %s271_s2 = inlined_call_operand.vmem [shape: f32[1,18], index: 2, kind: input, shape index: {}]   ;;  %s272_s3 = inlined_call_operand.hbm [shape: f32[20,18], index: 3, kind: output, shape index: {}]  }
   0x1   :  { %v81_v0 = vld [vmem:[%s270_s1 + $0x18] sm:$0xff]  ;;  %v80_v1 = vld [vmem:[%s270_s1 + $0x10] sm:$0xff]  ;;  %v238_v3 = vld [vmem:[%s269_s0] sm:$0xff] }
   0x2   :  { %152 = vmatpush.msra.mxu2 %v81_v0  ;;  %108 = vmatpush.msra.mxu0 %v81_v0  ;;  %v233_v2 = vld [vmem:[%s269_s0 + $0x10] sm:$0xf]  ;;  %v79_v4 = vld [vmem:[%s270_s1 + $0x8] sm:$0xff]  ;;  %v145_v6 = vmul.f32 -1.442695, %v238_v3 }
   0x3   :  { %151 = vmatpush.msra.mxu1 %v81_v0  ;;  %v147_v5 = vmul.f32 -1.442695, %v233_v2  ;;  %v248_v7 = vld [vmem:[%s269_s0 + $0x8] sm:$0xff] }
   0x4   :  { %154 = vmatpush.msra.mxu2 %v80_v1  ;;  %109 = vmatpush.msra.mxu0 %v80_v1  ;;  %v146_v8 = vmul.f32 -1.442695, %v248_v7 }
   0x5   :  { %8 = vsyncpa [#allocation3], 0  ;;  %v78_v9 = vld [vmem:[%s270_s1] sm:$0xff]  ;;  %163 = vpow2.f32 %v147_v5  ;;  %153 = vmatpush.msra.mxu1 %v80_v1  ;;  %vm86_vm10 = vcmask 261120   ;;  %vm122_vm13 = vcmask 146432   ;;  %s201_s26 = smov [#allocation2]  }
   0x6   :  { %156 = vmatpush.msra.mxu2 %v79_v4  ;;  %110 = vmatpush.msra.mxu0 %v79_v4  ;;  %165 = vpow2.f32 %v145_v6  ;;  %v162_v50 = vld [vmem:[%s271_s2] ss:$0 sm:$0xff]  ;;  %s131_s27 = sshll.u32 %s201_s26, 4  ;;  %s133_s30 = sshll.u32 %s272_s3, 4  ;;  %vm125_vm14 = vcmask 142336   ;;  %s132_s27 = int_to_ptr.vmem [resolvable:$true] %s131_s27  ;;  %s134_s30 = int_to_ptr.hbm [resolvable:$true] %s133_s30 }
   0x7   :  { %155 = vmatpush.msra.mxu1 %v79_v4  ;;  %167 = vpow2.f32 %v146_v8  ;;  %s202_s2 = smov 128   ;;  %s203_s4 = smov 8  }
   0x8   :  { %158 = vmatpush.msra.mxu2 %v78_v9  ;;  %111 = vmatpush.msra.mxu0 %v78_v9 }
   0x9   :  { %157 = vmatpush.msra.mxu1 %v78_v9 }
   0xb   :  { %v164_v10 = vpop.eup %163 }
   0xc   :  { %v166_v11 = vpop.eup %165  ;;  %v29_v12 = vadd.f32 1.0, %v164_v10 }
   0xd   :  { %v168_v13 = vpop.eup %167  ;;  %v27_v14 = vadd.f32 1.0, %v166_v11 }
   0xe   :  { %169 = vrcp.f32 %v29_v12  ;;  %v28_v15 = vadd.f32 1.0, %v168_v13  ;;  %v69_v19 = vand.u32 2147483647, %v29_v12  ;;  %v71_v20 = vand.u32 2147483648, %v29_v12 }
   0xf   :  { %171 = vrcp.f32 %v27_v14  ;;  %v41_v22 = vand.u32 2147483648, %v27_v14  ;;  %vm65_vm0 = vweird.f32 %v29_v12  ;;  %vm35_vm2 = vweird.f32 %v27_v14 }
  0x10   :  { %173 = vrcp.f32 %v28_v15  ;;  %v39_v26 = vand.u32 2147483647, %v27_v14  ;;  %vm254_vm4 = vcmp.eq.f32.partialorder %v69_v19, 8.507059e+37  ;;  %v72_v29 = vor.u32 1.1754944e-38, %v71_v20 }
  0x11   :  { %v42_v32 = vor.u32 1.1754944e-38, %v41_v22  ;;  %vm50_vm6 = vweird.f32 %v28_v15  ;;  %v56_v33 = vand.u32 2147483648, %v28_v15  ;;  %v54_v36 = vand.u32 2147483647, %v28_v15 }
  0x12   :  { %vm40_vm9 = vcmp.eq.f32.partialorder %v39_v26, 8.507059e+37 }
  0x13   :  { %v57_v42 = vor.u32 1.1754944e-38, %v56_v33  ;;  %vm55_vm12 = vcmp.eq.f32.partialorder %v54_v36, 8.507059e+37 }
  0x14   :  { %v170_v16 = vpop.eup %169 }
  0x15   :  { %v172_v17 = vpop.eup %171  ;;  %v61_v18 = vmul.f32 %v170_v16, %v29_v12  ;;  %vm66_vm1 = vweird.f32 %v170_v16 }
  0x16   :  { %v31_v21 = vmul.f32 %v172_v17, %v27_v14  ;;  %v174_v24 = vpop.eup %173  ;;  %vm36_vm3 = vweird.f32 %v172_v17  ;;  %vm67_vm5 = vmor %vm65_vm0, %vm66_vm1 }
  0x17   :  { %v62_v23 = vsub.f32 1.0, %v61_v18  ;;  %v46_v30 = vmul.f32 %v174_v24, %v28_v15  ;;  %vm37_vm7 = vmor %vm35_vm2, %vm36_vm3  ;;  %vm51_vm8 = vweird.f32 %v174_v24 }
  0x18   :  { %v32_v25 = vsub.f32 1.0, %v31_v21  ;;  %vm52_vm11 = vmor %vm50_vm6, %vm51_vm8 }
  0x19   :  { %v63_v27 = vmul.f32 %v170_v16, %v62_v23  ;;  %v47_v35 = vsub.f32 1.0, %v46_v30 }
  0x1a   :  { %v33_v31 = vmul.f32 %v172_v17, %v32_v25 }
  0x1b   :  { %v64_v34 = vadd.f32 %v170_v16, %v63_v27  ;;  %v48_v39 = vmul.f32 %v174_v24, %v47_v35 }
  0x1c   :  { %v34_v37 = vadd.f32 %v172_v17, %v33_v31 }
  0x1d   :  { %v68_v38 = vsel %vm67_vm5, %v170_v16, %v64_v34  ;;  %v49_v45 = vadd.f32 %v174_v24, %v48_v39 }
  0x1e   :  { %v73_v40 = vsel %vm254_vm4, %v72_v29, %v68_v38  ;;  %v38_v41 = vsel %vm37_vm7, %v172_v17, %v34_v37 }
  0x1f   :  { %v77_v43 = vmul.f32 %v73_v40, %v233_v2  ;;  %v43_v44 = vsel %vm40_vm9, %v42_v32, %v38_v41  ;;  %v53_v47 = vsel %vm52_vm11, %v174_v24, %v49_v45 }
  0x20   :  { %v75_v46 = vmul.f32 %v43_v44, %v238_v3  ;;  %v58_v48 = vsel %vm55_vm12, %v57_v42, %v53_v47 }
  0x21   :  { %150 = vmatmul.msk.f32.vlgmr.msra.gmra.mxu2 %vm86_vm10, %v77_v43  ;;  %v76_v49 = vmul.f32 %v58_v48, %v248_v7 }
  0x22   :  { %148 = vmatmul.msk.f32.vlgmr.msra.gmra.mxu0 %vm86_vm10, %v75_v46 }
  0x23   :  { %149 = vmatmul.msk.f32.vlgmr.msra.gmra.mxu1 %vm86_vm10, %v76_v49 }
  0x9f   :  { %v113_v51 = vpop.f32.mrf.mxu0 }
  0xa0   :  { %v114_v52 = vadd.f32 %v162_v50, %v113_v51  ;;  %v116_v53 = vpop.f32.mrf.mxu1 }
  0xa1   :  { %v117_v54 = vadd.f32 %v162_v50, %v116_v53 }
  0xa2   :  { %123 = vst.msk [vmem:[#allocation2] sm:$0xff] %vm122_vm13, %v114_v52 }
  0xa3   :  { %124 = vst.msk [vmem:[#allocation2 + $0x8] sm:$0xff] %vm122_vm13, %v117_v54 }
  0xa4   :  { %v119_v55 = vpop.f32.mrf.mxu2 }
  0xa5   :  { %v120_v56 = vadd.f32 %v162_v50, %v119_v55 }
  0xa7   :  { %126 = vst.msk [vmem:[#allocation2 + $0x10] sm:$0xf] %vm125_vm14, %v120_v56 }
  0xa8   :  { %139 = dma.vmem_to_hbm [thread:$0]  %s132_s27, 384, %s134_s30, [#allocation3], %s202_s2, %s202_s2, %s203_s4  }
  0xa9   :  { %199 = dma.done.wait [#allocation3], 384  }
  0xaa   :  { %200 = vsyncadd [#allocation3], 4294966912 }
  0xab   :  { %144 = vsyncpa [#allocation3], 1 }

</bundles_post_ra>
